<compile_context>
chip_gen: v7x
topology: tpu7x:2x2x1
jax: 0.10.0
libtpu: 0.0.40
codegen_flags: <defaults>
</compile_context>

<pallas_src>
import functools

import jax
import jax.numpy as jnp
from jax.experimental import pallas as pl
from jax.experimental.pallas import tpu as pltpu

BN_EPS = 1e-5
LANE = 128


def _round_up(x, n):
    return (x + n - 1) // n * n


def _choose_tm(m, kp, cp, budget_bytes=8 << 20):
    """Pick the M tile so double-buffered cols(bf16)+y(f32)+out(f32) tiles stay
    well under every generation's scoped-VMEM default."""
    per_row = 2 * kp * 2 + 2 * cp * 4 + 2 * cp * 4
    tm = max(16, min(budget_bytes // per_row, 1024))
    tm = (tm // 16) * 16                      # multiple of 16 (bf16 sublane pack)
    return min(tm, _round_up(m, 16))


# ---------------------------------------------------------------------------
# Pass 1: tiled matmul + per-tile BN partial statistics.
# ---------------------------------------------------------------------------
def _matmul_stats_kernel(cols_ref, w_ref, y_ref, stats_ref):
    # cols_ref : [tm, Kp]  bf16 im2col tile
    # w_ref    : [Kp, Cp]  bf16 weights (resident across the grid)
    # y_ref    : [tm, Cp]  f32 conv output tile
    # stats_ref: [8, Cp]   f32 partials: row 0 = sum(y), row 1 = sum(y*y)
    y = jnp.dot(cols_ref[...], w_ref[...], preferred_element_type=jnp.float32)
    y_ref[...] = y
    stats_ref[...] = jnp.zeros_like(stats_ref)
    stats_ref[0:1, :] = jnp.sum(y, axis=0, keepdims=True)
    stats_ref[1:2, :] = jnp.sum(y * y, axis=0, keepdims=True)


# ---------------------------------------------------------------------------
# Pass 2: normalize (folded per-channel scale/shift) + ReLU.
# ---------------------------------------------------------------------------
def _bn_relu_kernel(y_ref, scale_ref, shift_ref, o_ref):
    out = y_ref[...] * scale_ref[...] + shift_ref[...]
    o_ref[...] = jnp.maximum(out, 0.0).astype(o_ref.dtype)


def _im2col(x, kh, kw, stride, padding, dilation):
    """x: [N, Cin, H, W] -> cols: [N*Ho*Wo, Cin*kh*kw] (feature order (C, i, j))."""
    n, c, h, w = x.shape
    xp = jnp.pad(x, ((0, 0), (0, 0), (padding, padding), (padding, padding)))
    ho = (h + 2 * padding - dilation * (kh - 1) - 1) // stride + 1
    wo = (w + 2 * padding - dilation * (kw - 1) - 1) // stride + 1
    patches = []
    for i in range(kh):
        for j in range(kw):
            hs = i * dilation
            ws = j * dilation
            patch = xp[:, :,
                       hs:hs + (ho - 1) * stride + 1:stride,
                       ws:ws + (wo - 1) * stride + 1:stride]
            patches.append(patch)  # [N, C, Ho, Wo]
    col = jnp.stack(patches, axis=2)            # [N, C, kh*kw, Ho, Wo]
    col = col.reshape(n, c * kh * kw, ho, wo)   # channel-major, then (i, j)
    col = col.transpose(0, 2, 3, 1).reshape(n * ho * wo, c * kh * kw)
    return col, ho, wo


@functools.partial(jax.jit, static_argnames=("stride", "padding", "dilation", "groups"))
def conv_bn_relu(x, weight, gamma, beta, *, stride=1, padding=0, dilation=1, groups=1):
    """Fused Conv2d(bias=False) + BatchNorm2d(training batch stats) + ReLU.

    x      : [N, Cin, H, W]        (NCHW)
    weight : [Cout, Cin, kh, kw]   (PyTorch OIHW)
    gamma  : [Cout], beta: [Cout]
    returns: [N, Cout, Ho, Wo]     (NCHW)
    """
    assert groups == 1  # TODO(synk): grouped conv not implemented in this kernel
    n, cin, _, _ = x.shape
    cout, cin_w, kh, kw = weight.shape
    assert cin_w == cin

    # im2col in bf16 (MXU input dtype). M = N*Ho*Wo, K = Cin*kh*kw.
    cols, ho, wo = _im2col(x.astype(jnp.bfloat16), kh, kw, stride, padding, dilation)
    m, k = cols.shape

    # Lane-dense padding: K and Cout up to multiples of 128, M up to the tile.
    # Padded rows/cols are zero, so they contribute nothing to sums/sumsq.
    kp = _round_up(k, LANE)
    cp = _round_up(cout, LANE)
    tm = _choose_tm(m, kp, cp)
    m_pad = _round_up(m, tm)
    num_m = m_pad // tm
    # TODO(synk): tile K / Cout as additional grid axes for very large Cin*kh*kw.

    cols_p = jnp.pad(cols, ((0, m_pad - m), (0, kp - k)))
    w2d = weight.reshape(cout, k).T.astype(jnp.bfloat16)          # [K, Cout]
    w_p = jnp.pad(w2d, ((0, kp - k), (0, cp - cout)))

    flops1 = 2 * m_pad * kp * cp + 3 * m_pad * cp
    bytes1 = cols_p.size * 2 + w_p.size * 2 + m_pad * cp * 4 + num_m * 8 * cp * 4
    y_p, stats = pl.pallas_call(
        _matmul_stats_kernel,
        out_shape=(jax.ShapeDtypeStruct((m_pad, cp), jnp.float32),
                   jax.ShapeDtypeStruct((num_m * 8, cp), jnp.float32)),
        grid=(num_m,),
        in_specs=[
            pl.BlockSpec((tm, kp), lambda i: (i, 0)),
            pl.BlockSpec((kp, cp), lambda i: (0, 0)),    # weights resident
        ],
        out_specs=(
            pl.BlockSpec((tm, cp), lambda i: (i, 0)),
            pl.BlockSpec((8, cp), lambda i: (i, 0)),
        ),
        compiler_params=pltpu.CompilerParams(dimension_semantics=("parallel",)),
        cost_estimate=pl.CostEstimate(
            flops=flops1, transcendentals=0, bytes_accessed=bytes1),
    )(cols_p, w_p)

    # Reduce per-tile partials -> global BatchNorm2d training statistics
    # (biased variance, reduction over N*Ho*Wo real rows).
    stats = stats.reshape(num_m, 8, cp)
    sum_c = jnp.sum(stats[:, 0, :], axis=0)                  # [Cp]
    sq_c = jnp.sum(stats[:, 1, :], axis=0)                   # [Cp]
    mean = sum_c / m
    var = jnp.maximum(sq_c / m - mean * mean, 0.0)
    inv = jax.lax.rsqrt(var + BN_EPS)
    gamma_p = jnp.pad(gamma.astype(jnp.float32), (0, cp - cout))
    beta_p = jnp.pad(beta.astype(jnp.float32), (0, cp - cout))
    scale = (gamma_p * inv).reshape(1, cp)
    shift = (beta_p - mean * gamma_p * inv).reshape(1, cp)
    # TODO(synk): running_mean/running_var (unbiased) updates are not returned.

    flops2 = 3 * m_pad * cp
    bytes2 = 2 * m_pad * cp * 4 + 2 * cp * 4
    out_p = pl.pallas_call(
        _bn_relu_kernel,
        out_shape=jax.ShapeDtypeStruct((m_pad, cp), jnp.float32),
        grid=(num_m,),
        in_specs=[
            pl.BlockSpec((tm, cp), lambda i: (i, 0)),
            pl.BlockSpec((1, cp), lambda i: (0, 0)),     # scale resident
            pl.BlockSpec((1, cp), lambda i: (0, 0)),     # shift resident
        ],
        out_specs=pl.BlockSpec((tm, cp), lambda i: (i, 0)),
        compiler_params=pltpu.CompilerParams(dimension_semantics=("parallel",)),
        cost_estimate=pl.CostEstimate(
            flops=flops2, transcendentals=0, bytes_accessed=bytes2),
    )(y_p, scale, shift)

    out2d = out_p[:m, :cout]
    # TODO(synk): consumers accepting NHWC could skip this transpose (extra HBM pass).
    return out2d.reshape(n, ho, wo, cout).transpose(0, 3, 1, 2)


def _reference(x, weight, gamma, beta, *, stride, padding, dilation):
    # Conv on bf16-cast inputs with f32 accumulation (mirrors the kernel's MXU
    # path); BatchNorm (biased batch var) + ReLU in f32.
    y = jax.lax.conv_general_dilated(
        x.astype(jnp.bfloat16), weight.astype(jnp.bfloat16),
        window_strides=(stride, stride),
        padding=[(padding, padding), (padding, padding)],
        rhs_dilation=(dilation, dilation),
        dimension_numbers=("NCHW", "OIHW", "NCHW"),
        preferred_element_type=jnp.float32,
    )
    mean = jnp.mean(y, axis=(0, 2, 3), keepdims=True)
    var = jnp.mean((y - mean) ** 2, axis=(0, 2, 3), keepdims=True)
    y_hat = (y - mean) * jax.lax.rsqrt(var + BN_EPS)
    y_hat = y_hat * gamma.reshape(1, -1, 1, 1) + beta.reshape(1, -1, 1, 1)
    return jnp.maximum(y_hat, 0.0)


if __name__ == "__main__":
    # Shapes consistent with ConvBnRelu(in_channel=4, out_channel=8,
    # kernel_size=3, stride=1, padding=1).
    N, CIN, H, W = 2, 4, 16, 16
    COUT, KH, KW = 8, 3, 3
    STRIDE, PADDING, DILATION = 1, 1, 1

    key = jax.random.PRNGKey(0)
    kx, kw_, kg, kb = jax.random.split(key, 4)
    x = jax.random.normal(kx, (N, CIN, H, W), dtype=jnp.float32)
    weight = jax.random.normal(kw_, (COUT, CIN, KH, KW), dtype=jnp.float32) * 0.1
    gamma = 1.0 + 0.1 * jax.random.normal(kg, (COUT,), dtype=jnp.float32)
    beta = 0.1 * jax.random.normal(kb, (COUT,), dtype=jnp.float32)

    out = conv_bn_relu(x, weight, gamma, beta,
                       stride=STRIDE, padding=PADDING, dilation=DILATION)
    out = jax.block_until_ready(out)

    ref = _reference(x, weight, gamma, beta,
                     stride=STRIDE, padding=PADDING, dilation=DILATION)
    assert out.shape == (N, COUT, H, W), out.shape
    max_err = float(jnp.max(jnp.abs(out - ref)))
    assert jnp.allclose(out, ref, rtol=2e-3, atol=2e-3), max_err

    print("KERNEL_OK")
</pallas_src>

<mosaic_0001>
module attributes {stable_mosaic.version = 11 : i64} {
  func.func @_matmul_stats_kernel(%arg0: i32, %arg1: memref<512x128xbf16, #tpu.memory_space<vmem>>, %arg2: memref<128x128xbf16, #tpu.memory_space<vmem>>, %arg3: memref<512x128xf32, #tpu.memory_space<vmem>>, %arg4: memref<8x128xf32, #tpu.memory_space<vmem>>) attributes {dimension_semantics = [#tpu.dimension_semantics<parallel>], iteration_bounds = array<i64: 1>, scalar_prefetch = 0 : i64, scratch_operands = 0 : i64, tpu.core_type = #tpu.core_type<tc>, window_params = [{transform_indices = @transform_0, window_bounds = array<i64: 512, 128>}, {pipeline_mode = #tpu.pipeline_mode<synchronous>, transform_indices = @transform_1, window_bounds = array<i64: 128, 128>}, {transform_indices = @transform_2, window_bounds = array<i64: 512, 128>}, {transform_indices = @transform_3, window_bounds = array<i64: 8, 128>}]} {
    %c0 = arith.constant 0 : index
    %c0_0 = arith.constant 0 : index
    %0 = vector.load %arg1[%c0, %c0_0] : memref<512x128xbf16, #tpu.memory_space<vmem>>, vector<512x128xbf16>
    %c0_1 = arith.constant 0 : index
    %c0_2 = arith.constant 0 : index
    %1 = vector.load %arg2[%c0_1, %c0_2] : memref<128x128xbf16, #tpu.memory_space<vmem>>, vector<128x128xbf16>
    %cst = arith.constant dense<0.000000e+00> : vector<512x128xf32>
    %2 = tpu.matmul %0, %1, %cst {dimension_numbers = #tpu.dot_dimension_numbers<[1], [0], [0], [1], [0, 0, 1, 1], [], []>} : vector<512x128xbf16>, vector<128x128xbf16>, vector<512x128xf32> -> vector<512x128xf32>
    %c0_3 = arith.constant 0 : index
    %c0_4 = arith.constant 0 : index
    %3 = vector.load %arg3[%c0_3, %c0_4] : memref<512x128xf32, #tpu.memory_space<vmem>>, vector<512x128xf32>
    tpu.vector_store %arg3[%c0_3, %c0_4], %2 {strides = array<i32>} : memref<512x128xf32, #tpu.memory_space<vmem>>, vector<512x128xf32>,
    %cst_5 = arith.constant 0.000000e+00 : f32
    %4 = vector.broadcast %cst_5 : f32 to vector<8x128xf32>
    %c0_6 = arith.constant 0 : index
    %c0_7 = arith.constant 0 : index
    %5 = vector.load %arg4[%c0_6, %c0_7] : memref<8x128xf32, #tpu.memory_space<vmem>>, vector<8x128xf32>
    tpu.vector_store %arg4[%c0_6, %c0_7], %4 {strides = array<i32>} : memref<8x128xf32, #tpu.memory_space<vmem>>, vector<8x128xf32>,
    %cst_8 = arith.constant dense<0.000000e+00> : vector<128xf32>
    %6 = vector.multi_reduction <add>, %2, %cst_8 [0] : vector<512x128xf32> to vector<128xf32>
    %7 = vector.shape_cast %6 : vector<128xf32> to vector<1x128xf32>
    %c0_9 = arith.constant 0 : index
    %c0_10 = arith.constant 0 : index
    %8 = vector.load %arg4[%c0_9, %c0_10] : memref<8x128xf32, #tpu.memory_space<vmem>>, vector<1x128xf32>
    tpu.vector_store %arg4[%c0_9, %c0_10], %7 {strides = array<i32>} : memref<8x128xf32, #tpu.memory_space<vmem>>, vector<1x128xf32>,
    %9 = arith.mulf %2, %2 : vector<512x128xf32>
    %cst_11 = arith.constant dense<0.000000e+00> : vector<128xf32>
    %10 = vector.multi_reduction <add>, %9, %cst_11 [0] : vector<512x128xf32> to vector<128xf32>
    %11 = vector.shape_cast %10 : vector<128xf32> to vector<1x128xf32>
    %c1 = arith.constant 1 : index
    %c0_12 = arith.constant 0 : index
    %12 = vector.load %arg4[%c1, %c0_12] : memref<8x128xf32, #tpu.memory_space<vmem>>, vector<1x128xf32>
    tpu.vector_store %arg4[%c1, %c0_12], %11 {strides = array<i32>} : memref<8x128xf32, #tpu.memory_space<vmem>>, vector<1x128xf32>,
    return
  }
  func.func @transform_0(%arg0: i32) -> (i32, i32) {
    %c0_i32 = arith.constant 0 : i32
    %c0_i32_0 = arith.constant 0 : i32
    return %arg0, %c0_i32 : i32, i32
  }
  func.func @transform_1(%arg0: i32) -> (i32, i32) {
    %c0_i32 = arith.constant 0 : i32
    %c0_i32_0 = arith.constant 0 : i32
    %c0_i32_1 = arith.constant 0 : i32
    return %c0_i32, %c0_i32_0 : i32, i32
  }
  func.func @transform_2(%arg0: i32) -> (i32, i32) {
    %c0_i32 = arith.constant 0 : i32
    %c0_i32_0 = arith.constant 0 : i32
    return %arg0, %c0_i32 : i32, i32
  }
  func.func @transform_3(%arg0: i32) -> (i32, i32) {
    %c0_i32 = arith.constant 0 : i32
    %c0_i32_0 = arith.constant 0 : i32
    return %arg0, %c0_i32 : i32, i32
  }
}

module attributes {stable_mosaic.version = 11 : i64} {
  func.func @_bn_relu_kernel(%arg0: i32, %arg1: memref<512x128xf32, #tpu.memory_space<vmem>>, %arg2: memref<1x128xf32, #tpu.memory_space<vmem>>, %arg3: memref<1x128xf32, #tpu.memory_space<vmem>>, %arg4: memref<512x128xf32, #tpu.memory_space<vmem>>) attributes {dimension_semantics = [#tpu.dimension_semantics<parallel>], iteration_bounds = array<i64: 1>, scalar_prefetch = 0 : i64, scratch_operands = 0 : i64, tpu.core_type = #tpu.core_type<tc>, window_params = [{transform_indices = @transform_0, window_bounds = array<i64: 512, 128>}, {pipeline_mode = #tpu.pipeline_mode<synchronous>, transform_indices = @transform_1, window_bounds = array<i64: 1, 128>}, {pipeline_mode = #tpu.pipeline_mode<synchronous>, transform_indices = @transform_2, window_bounds = array<i64: 1, 128>}, {transform_indices = @transform_3, window_bounds = array<i64: 512, 128>}]} {
    %c0 = arith.constant 0 : index
    %c0_0 = arith.constant 0 : index
    %0 = vector.load %arg1[%c0, %c0_0] : memref<512x128xf32, #tpu.memory_space<vmem>>, vector<512x128xf32>
    %c0_1 = arith.constant 0 : index
    %c0_2 = arith.constant 0 : index
    %1 = vector.load %arg2[%c0_1, %c0_2] : memref<1x128xf32, #tpu.memory_space<vmem>>, vector<1x128xf32>
    %2 = vector.broadcast %1 : vector<1x128xf32> to vector<512x128xf32>
    %3 = arith.mulf %0, %2 : vector<512x128xf32>
    %c0_3 = arith.constant 0 : index
    %c0_4 = arith.constant 0 : index
    %4 = vector.load %arg3[%c0_3, %c0_4] : memref<1x128xf32, #tpu.memory_space<vmem>>, vector<1x128xf32>
    %5 = vector.broadcast %4 : vector<1x128xf32> to vector<512x128xf32>
    %6 = arith.addf %3, %5 : vector<512x128xf32>
    %cst = arith.constant 0.000000e+00 : f32
    %7 = vector.broadcast %cst : f32 to vector<512x128xf32>
    %8 = arith.maximumf %6, %7 : vector<512x128xf32>
    %c0_5 = arith.constant 0 : index
    %c0_6 = arith.constant 0 : index
    %9 = vector.load %arg4[%c0_5, %c0_6] : memref<512x128xf32, #tpu.memory_space<vmem>>, vector<512x128xf32>
    tpu.vector_store %arg4[%c0_5, %c0_6], %8 {strides = array<i32>} : memref<512x128xf32, #tpu.memory_space<vmem>>, vector<512x128xf32>,
    return
  }
  func.func @transform_0(%arg0: i32) -> (i32, i32) {
    %c0_i32 = arith.constant 0 : i32
    %c0_i32_0 = arith.constant 0 : i32
    return %arg0, %c0_i32 : i32, i32
  }
  func.func @transform_1(%arg0: i32) -> (i32, i32) {
    %c0_i32 = arith.constant 0 : i32
    %c0_i32_0 = arith.constant 0 : i32
    %c0_i32_1 = arith.constant 0 : i32
    return %c0_i32, %c0_i32_0 : i32, i32
  }
  func.func @transform_2(%arg0: i32) -> (i32, i32) {
    %c0_i32 = arith.constant 0 : i32
    %c0_i32_0 = arith.constant 0 : i32
    %c0_i32_1 = arith.constant 0 : i32
    return %c0_i32, %c0_i32_0 : i32, i32
  }
  func.func @transform_3(%arg0: i32) -> (i32, i32) {
    %c0_i32 = arith.constant 0 : i32
    %c0_i32_0 = arith.constant 0 : i32
    return %arg0, %c0_i32 : i32, i32
  }
}

</mosaic_0001>

<bundles_post_ra>
// kernel: conv_bn_relu.3
= control target key start
LH: loop header
LB: loop body
LE: loop exit
PB: predicated region body
PF: predicated region fallthrough
CT: control target
= control target key end

     0   :  { %s896_s0 = inlined_call_operand.vmem [shape: f32[512,128], index: 0, kind: input, shape index: {}]   ;;  %s897_s1 = inlined_call_operand.vmem [shape: f32[1,128], index: 1, kind: input, shape index: {}]   ;;  %s898_s2 = inlined_call_operand.vmem [shape: f32[1,128], index: 2, kind: input, shape index: {}]   ;;  %s899_s3 = inlined_call_operand.vmem [shape: f32[512,128], index: 3, kind: output, shape index: {}]  }
   0x1   :  { %v14_v0 = vld [vmem:[%s896_s0] sm:$0xff]  ;;  %v15_v4 = vld [vmem:[%s896_s0 + $0x8] sm:$0xff]  ;;  %v16_v5 = vld [vmem:[%s896_s0 + $0x10] sm:$0xff] }
   0x2   :  { %v380_v1 = vld [vmem:[%s897_s1] ss:$0 sm:$0xff]  ;;  %v17_v6 = vld [vmem:[%s896_s0 + $0x18] sm:$0xff]  ;;  %v19_v11 = vld [vmem:[%s896_s0 + $0x28] sm:$0xff] }
   0x3   :  { %v385_v2 = vld [vmem:[%s898_s2] ss:$0 sm:$0xff]  ;;  %v85_v3 = vmul.f32 %v380_v1, %v14_v0  ;;  %v86_v7 = vmul.f32 %v380_v1, %v15_v4  ;;  %v87_v8 = vmul.f32 %v380_v1, %v16_v5  ;;  %v88_v9 = vmul.f32 %v380_v1, %v17_v6  ;;  %v20_v12 = vld [vmem:[%s896_s0 + $0x30] sm:$0xff]  ;;  %v21_v17 = vld [vmem:[%s896_s0 + $0x38] sm:$0xff] }
   0x4   :  { %v18_v10 = vld [vmem:[%s896_s0 + $0x20] sm:$0xff]  ;;  %v90_v15 = vmul.f32 %v380_v1, %v19_v11  ;;  %v91_v16 = vmul.f32 %v380_v1, %v20_v12  ;;  %v92_v21 = vmul.f32 %v380_v1, %v21_v17  ;;  %v23_v27 = vld [vmem:[%s896_s0 + $0x48] sm:$0xff]  ;;  %v24_v28 = vld [vmem:[%s896_s0 + $0x50] sm:$0xff] }
   0x5   :  { %v156_v13 = vadd.f32 %v385_v2, %v85_v3  ;;  %v89_v14 = vmul.f32 %v380_v1, %v18_v10  ;;  %v157_v18 = vadd.f32 %v385_v2, %v86_v7  ;;  %v158_v19 = vadd.f32 %v385_v2, %v87_v8  ;;  %v22_v22 = vld [vmem:[%s896_s0 + $0x40] sm:$0xff]  ;;  %v25_v29 = vld [vmem:[%s896_s0 + $0x58] sm:$0xff]  ;;  %v27_v35 = vld [vmem:[%s896_s0 + $0x68] sm:$0xff] }
   0x6   :  { %v159_v20 = vadd.f32 %v385_v2, %v88_v9  ;;  %v161_v25 = vadd.f32 %v385_v2, %v90_v15  ;;  %v162_v26 = vadd.f32 %v385_v2, %v91_v16  ;;  %v163_v33 = vadd.f32 %v385_v2, %v92_v21  ;;  %v26_v34 = vld [vmem:[%s896_s0 + $0x60] sm:$0xff]  ;;  %v28_v36 = vld [vmem:[%s896_s0 + $0x70] sm:$0xff]  ;;  %v29_v41 = vld [vmem:[%s896_s0 + $0x78] sm:$0xff] }
   0x7   :  { %v220_v23 = vmax.f32 %v156_v13, 0.0  ;;  %v160_v24 = vadd.f32 %v385_v2, %v89_v14  ;;  %v221_v30 = vmax.f32 %v157_v18, 0.0  ;;  %v222_v31 = vmax.f32 %v158_v19, 0.0  ;;  %v30_v54 = vld [vmem:[%s896_s0 + $0x80] sm:$0xff]  ;;  %v31_v59 = vld [vmem:[%s896_s0 + $0x88] sm:$0xff]  ;;  %v32_v60 = vld [vmem:[%s896_s0 + $0x90] sm:$0xff] }
   0x8   :  { %v223_v32 = vmax.f32 %v159_v20, 0.0  ;;  %v225_v38 = vmax.f32 %v161_v25, 0.0  ;;  %v226_v39 = vmax.f32 %v162_v26, 0.0  ;;  %v93_v40 = vmul.f32 %v380_v1, %v22_v22  ;;  %v33_v61 = vld [vmem:[%s896_s0 + $0x98] sm:$0xff]  ;;  %v34_v4 = vld [vmem:[%s896_s0 + $0xa0] sm:$0xff]  ;;  %v35_v5 = vld [vmem:[%s896_s0 + $0xa8] sm:$0xff] }
   0x9   :  { %284 = vst [vmem:[%s899_s3] sm:$0xff] %v220_v23  ;;  %v224_v37 = vmax.f32 %v160_v24, 0.0  ;;  %285 = vst [vmem:[%s899_s3 + $0x8] sm:$0xff] %v221_v30  ;;  %v227_v42 = vmax.f32 %v163_v33, 0.0  ;;  %v94_v43 = vmul.f32 %v380_v1, %v23_v27  ;;  %v95_v44 = vmul.f32 %v380_v1, %v24_v28  ;;  %v36_v6 = vld [vmem:[%s896_s0 + $0xb0] sm:$0xff]  ;;  %v37_v11 = vld [vmem:[%s896_s0 + $0xb8] sm:$0xff] }
   0xa   :  { %286 = vst [vmem:[%s899_s3 + $0x10] sm:$0xff] %v222_v31  ;;  %287 = vst [vmem:[%s899_s3 + $0x18] sm:$0xff] %v223_v32  ;;  %v96_v45 = vmul.f32 %v380_v1, %v25_v29  ;;  %v164_v46 = vadd.f32 %v385_v2, %v93_v40  ;;  %v97_v47 = vmul.f32 %v380_v1, %v26_v34  ;;  %v38_v24 = vld [vmem:[%s896_s0 + $0xc0] sm:$0xff]  ;;  %v39_v29 = vld [vmem:[%s896_s0 + $0xc8] sm:$0xff] }
   0xb   :  { %288 = vst [vmem:[%s899_s3 + $0x20] sm:$0xff] %v224_v37  ;;  %289 = vst [vmem:[%s899_s3 + $0x28] sm:$0xff] %v225_v38  ;;  %v98_v48 = vmul.f32 %v380_v1, %v27_v35  ;;  %v99_v49 = vmul.f32 %v380_v1, %v28_v36  ;;  %v165_v50 = vadd.f32 %v385_v2, %v94_v43  ;;  %v40_v30 = vld [vmem:[%s896_s0 + $0xd0] sm:$0xff]  ;;  %v41_v31 = vld [vmem:[%s896_s0 + $0xd8] sm:$0xff] }
   0xc   :  { %290 = vst [vmem:[%s899_s3 + $0x30] sm:$0xff] %v226_v39  ;;  %291 = vst [vmem:[%s899_s3 + $0x38] sm:$0xff] %v227_v42  ;;  %v166_v51 = vadd.f32 %v385_v2, %v95_v44  ;;  %v167_v52 = vadd.f32 %v385_v2, %v96_v45  ;;  %v100_v53 = vmul.f32 %v380_v1, %v29_v41  ;;  %v228_v55 = vmax.f32 %v164_v46, 0.0  ;;  %v42_v36 = vld [vmem:[%s896_s0 + $0xe0] sm:$0xff]  ;;  %v43_v37 = vld [vmem:[%s896_s0 + $0xe8] sm:$0xff] }
   0xd   :  { %v168_v56 = vadd.f32 %v385_v2, %v97_v47  ;;  %v169_v57 = vadd.f32 %v385_v2, %v98_v48  ;;  %v170_v58 = vadd.f32 %v385_v2, %v99_v49  ;;  %v229_v62 = vmax.f32 %v165_v50, 0.0  ;;  %v44_v38 = vld [vmem:[%s896_s0 + $0xf0] sm:$0xff]  ;;  %v45_v43 = vld [vmem:[%s896_s0 + $0xf8] sm:$0xff] }
   0xe   :  { %v230_v63 = vmax.f32 %v166_v51, 0.0  ;;  %v231_v0 = vmax.f32 %v167_v52, 0.0  ;;  %v171_v3 = vadd.f32 %v385_v2, %v100_v53  ;;  %292 = vst [vmem:[%s899_s3 + $0x40] sm:$0xff] %v228_v55  ;;  %v101_v10 = vmul.f32 %v380_v1, %v30_v54 }
   0xf   :  { %v232_v7 = vmax.f32 %v168_v56, 0.0  ;;  %v233_v8 = vmax.f32 %v169_v57, 0.0  ;;  %v234_v9 = vmax.f32 %v170_v58, 0.0  ;;  %293 = vst [vmem:[%s899_s3 + $0x48] sm:$0xff] %v229_v62  ;;  %v102_v13 = vmul.f32 %v380_v1, %v31_v59  ;;  %v46_v56 = vld [vmem:[%s896_s0 + $0x100] sm:$0xff]  ;;  %v48_v62 = vld [vmem:[%s896_s0 + $0x110] sm:$0xff] }
  0x10   :  { %294 = vst [vmem:[%s899_s3 + $0x50] sm:$0xff] %v230_v63  ;;  %295 = vst [vmem:[%s899_s3 + $0x58] sm:$0xff] %v231_v0  ;;  %v235_v12 = vmax.f32 %v171_v3, 0.0  ;;  %v103_v14 = vmul.f32 %v380_v1, %v32_v60  ;;  %v104_v15 = vmul.f32 %v380_v1, %v33_v61  ;;  %v172_v16 = vadd.f32 %v385_v2, %v101_v10  ;;  %v47_v61 = vld [vmem:[%s896_s0 + $0x108] sm:$0xff]  ;;  %v49_v63 = vld [vmem:[%s896_s0 + $0x118] sm:$0xff] }
  0x11   :  { %296 = vst [vmem:[%s899_s3 + $0x60] sm:$0xff] %v232_v7  ;;  %297 = vst [vmem:[%s899_s3 + $0x68] sm:$0xff] %v233_v8  ;;  %v105_v17 = vmul.f32 %v380_v1, %v34_v4  ;;  %v106_v18 = vmul.f32 %v380_v1, %v35_v5  ;;  %v107_v19 = vmul.f32 %v380_v1, %v36_v6  ;;  %v50_v6 = vld [vmem:[%s896_s0 + $0x120] sm:$0xff]  ;;  %v51_v7 = vld [vmem:[%s896_s0 + $0x128] sm:$0xff] }
  0x12   :  { %298 = vst [vmem:[%s899_s3 + $0x70] sm:$0xff] %v234_v9  ;;  %299 = vst [vmem:[%s899_s3 + $0x78] sm:$0xff] %v235_v12  ;;  %v173_v20 = vadd.f32 %v385_v2, %v102_v13  ;;  %v174_v21 = vadd.f32 %v385_v2, %v103_v14  ;;  %v175_v22 = vadd.f32 %v385_v2, %v104_v15  ;;  %v236_v25 = vmax.f32 %v172_v16, 0.0  ;;  %v52_v8 = vld [vmem:[%s896_s0 + $0x130] sm:$0xff]  ;;  %v53_v13 = vld [vmem:[%s896_s0 + $0x138] sm:$0xff] }
  0x13   :  { %v108_v23 = vmul.f32 %v380_v1, %v37_v11  ;;  %v176_v26 = vadd.f32 %v385_v2, %v105_v17  ;;  %v177_v27 = vadd.f32 %v385_v2, %v106_v18  ;;  %v178_v28 = vadd.f32 %v385_v2, %v107_v19 }
  0x14   :  { %v237_v32 = vmax.f32 %v173_v20, 0.0  ;;  %v238_v33 = vmax.f32 %v174_v21, 0.0  ;;  %v239_v34 = vmax.f32 %v175_v22, 0.0  ;;  %300 = vst [vmem:[%s899_s3 + $0x80] sm:$0xff] %v236_v25  ;;  %v109_v42 = vmul.f32 %v380_v1, %v38_v24 }
  0x15   :  { %v179_v35 = vadd.f32 %v385_v2, %v108_v23  ;;  %v240_v39 = vmax.f32 %v176_v26, 0.0  ;;  %v241_v40 = vmax.f32 %v177_v27, 0.0  ;;  %v242_v41 = vmax.f32 %v178_v28, 0.0  ;;  %v54_v26 = vld [vmem:[%s896_s0 + $0x140] sm:$0xff] }
  0x16   :  { %301 = vst [vmem:[%s899_s3 + $0x88] sm:$0xff] %v237_v32  ;;  %302 = vst [vmem:[%s899_s3 + $0x90] sm:$0xff] %v238_v33  ;;  %v110_v45 = vmul.f32 %v380_v1, %v39_v29  ;;  %v111_v46 = vmul.f32 %v380_v1, %v40_v30  ;;  %v112_v47 = vmul.f32 %v380_v1, %v41_v31  ;;  %v55_v31 = vld [vmem:[%s896_s0 + $0x148] sm:$0xff]  ;;  %v56_v32 = vld [vmem:[%s896_s0 + $0x150] sm:$0xff] }
  0x17   :  { %303 = vst [vmem:[%s899_s3 + $0x98] sm:$0xff] %v239_v34  ;;  %v243_v44 = vmax.f32 %v179_v35, 0.0  ;;  %304 = vst [vmem:[%s899_s3 + $0xa0] sm:$0xff] %v240_v39  ;;  %v180_v48 = vadd.f32 %v385_v2, %v109_v42  ;;  %v113_v49 = vmul.f32 %v380_v1, %v42_v36  ;;  %v114_v50 = vmul.f32 %v380_v1, %v43_v37  ;;  %v57_v33 = vld [vmem:[%s896_s0 + $0x158] sm:$0xff]  ;;  %v59_v39 = vld [vmem:[%s896_s0 + $0x168] sm:$0xff] }
  0x18   :  { %305 = vst [vmem:[%s899_s3 + $0xa8] sm:$0xff] %v241_v40  ;;  %306 = vst [vmem:[%s899_s3 + $0xb0] sm:$0xff] %v242_v41  ;;  %v115_v51 = vmul.f32 %v380_v1, %v44_v38  ;;  %v181_v52 = vadd.f32 %v385_v2, %v110_v45  ;;  %v182_v53 = vadd.f32 %v385_v2, %v111_v46  ;;  %v58_v38 = vld [vmem:[%s896_s0 + $0x160] sm:$0xff]  ;;  %v60_v40 = vld [vmem:[%s896_s0 + $0x170] sm:$0xff] }
  0x19   :  { %307 = vst [vmem:[%s899_s3 + $0xb8] sm:$0xff] %v243_v44  ;;  %v183_v54 = vadd.f32 %v385_v2, %v112_v47  ;;  %v116_v55 = vmul.f32 %v380_v1, %v45_v43  ;;  %v244_v57 = vmax.f32 %v180_v48, 0.0  ;;  %v184_v58 = vadd.f32 %v385_v2, %v113_v49  ;;  %v61_v45 = vld [vmem:[%s896_s0 + $0x178] sm:$0xff] }
  0x1a   :  { %v185_v59 = vadd.f32 %v385_v2, %v114_v50  ;;  %v186_v60 = vadd.f32 %v385_v2, %v115_v51  ;;  %v245_v0 = vmax.f32 %v181_v52, 0.0  ;;  %v246_v3 = vmax.f32 %v182_v53, 0.0 }
  0x1b   :  { %v247_v4 = vmax.f32 %v183_v54, 0.0  ;;  %v187_v5 = vadd.f32 %v385_v2, %v116_v55  ;;  %308 = vst [vmem:[%s899_s3 + $0xc0] sm:$0xff] %v244_v57  ;;  %v248_v9 = vmax.f32 %v184_v58, 0.0  ;;  %v117_v12 = vmul.f32 %v380_v1, %v46_v56  ;;  %v62_v58 = vld [vmem:[%s896_s0 + $0x180] sm:$0xff] }
  0x1c   :  { %v249_v10 = vmax.f32 %v185_v59, 0.0  ;;  %v250_v11 = vmax.f32 %v186_v60, 0.0  ;;  %309 = vst [vmem:[%s899_s3 + $0xc8] sm:$0xff] %v245_v0  ;;  %310 = vst [vmem:[%s899_s3 + $0xd0] sm:$0xff] %v246_v3  ;;  %v118_v15 = vmul.f32 %v380_v1, %v47_v61  ;;  %v119_v16 = vmul.f32 %v380_v1, %v48_v62  ;;  %v64_v0 = vld [vmem:[%s896_s0 + $0x190] sm:$0xff]  ;;  %v65_v3 = vld [vmem:[%s896_s0 + $0x198] sm:$0xff] }
  0x1d   :  { %311 = vst [vmem:[%s899_s3 + $0xd8] sm:$0xff] %v247_v4  ;;  %v251_v14 = vmax.f32 %v187_v5, 0.0  ;;  %v120_v17 = vmul.f32 %v380_v1, %v49_v63  ;;  %312 = vst [vmem:[%s899_s3 + $0xe0] sm:$0xff] %v248_v9  ;;  %v188_v18 = vadd.f32 %v385_v2, %v117_v12  ;;  %v121_v19 = vmul.f32 %v380_v1, %v50_v6  ;;  %v63_v63 = vld [vmem:[%s896_s0 + $0x188] sm:$0xff] }
  0x1e   :  { %313 = vst [vmem:[%s899_s3 + $0xe8] sm:$0xff] %v249_v10  ;;  %314 = vst [vmem:[%s899_s3 + $0xf0] sm:$0xff] %v250_v11  ;;  %v122_v20 = vmul.f32 %v380_v1, %v51_v7  ;;  %v123_v21 = vmul.f32 %v380_v1, %v52_v8  ;;  %v189_v22 = vadd.f32 %v385_v2, %v118_v15  ;;  %v66_v8 = vld [vmem:[%s896_s0 + $0x1a0] sm:$0xff]  ;;  %v67_v9 = vld [vmem:[%s896_s0 + $0x1a8] sm:$0xff] }
  0x1f   :  { %315 = vst [vmem:[%s899_s3 + $0xf8] sm:$0xff] %v251_v14  ;;  %v190_v23 = vadd.f32 %v385_v2, %v119_v16  ;;  %v191_v24 = vadd.f32 %v385_v2, %v120_v17  ;;  %v124_v25 = vmul.f32 %v380_v1, %v53_v13  ;;  %v252_v27 = vmax.f32 %v188_v18, 0.0  ;;  %v68_v10 = vld [vmem:[%s896_s0 + $0x1b0] sm:$0xff]  ;;  %v69_v15 = vld [vmem:[%s896_s0 + $0x1b8] sm:$0xff] }
  0x20   :  { %v192_v28 = vadd.f32 %v385_v2, %v121_v19  ;;  %v193_v29 = vadd.f32 %v385_v2, %v122_v20  ;;  %v194_v30 = vadd.f32 %v385_v2, %v123_v21  ;;  %v253_v34 = vmax.f32 %v189_v22, 0.0 }
  0x21   :  { %v254_v35 = vmax.f32 %v190_v23, 0.0  ;;  %v255_v36 = vmax.f32 %v191_v24, 0.0  ;;  %v195_v37 = vadd.f32 %v385_v2, %v124_v25  ;;  %316 = vst [vmem:[%s899_s3 + $0x100] sm:$0xff] %v252_v27  ;;  %v125_v44 = vmul.f32 %v380_v1, %v54_v26 }
  0x22   :  { %v256_v41 = vmax.f32 %v192_v28, 0.0  ;;  %v257_v42 = vmax.f32 %v193_v29, 0.0  ;;  %v258_v43 = vmax.f32 %v194_v30, 0.0  ;;  %317 = vst [vmem:[%s899_s3 + $0x108] sm:$0xff] %v253_v34  ;;  %v126_v47 = vmul.f32 %v380_v1, %v55_v31  ;;  %v70_v28 = vld [vmem:[%s896_s0 + $0x1c0] sm:$0xff]  ;;  %v72_v34 = vld [vmem:[%s896_s0 + $0x1d0] sm:$0xff] }
  0x23   :  { %318 = vst [vmem:[%s899_s3 + $0x110] sm:$0xff] %v254_v35  ;;  %319 = vst [vmem:[%s899_s3 + $0x118] sm:$0xff] %v255_v36  ;;  %v259_v46 = vmax.f32 %v195_v37, 0.0  ;;  %v127_v48 = vmul.f32 %v380_v1, %v56_v32  ;;  %v128_v49 = vmul.f32 %v380_v1, %v57_v33  ;;  %v196_v50 = vadd.f32 %v385_v2, %v125_v44  ;;  %v71_v33 = vld [vmem:[%s896_s0 + $0x1c8] sm:$0xff]  ;;  %v73_v35 = vld [vmem:[%s896_s0 + $0x1d8] sm:$0xff] }
  0x24   :  { %320 = vst [vmem:[%s899_s3 + $0x120] sm:$0xff] %v256_v41  ;;  %321 = vst [vmem:[%s899_s3 + $0x128] sm:$0xff] %v257_v42  ;;  %v129_v51 = vmul.f32 %v380_v1, %v58_v38  ;;  %v130_v52 = vmul.f32 %v380_v1, %v59_v39  ;;  %v131_v53 = vmul.f32 %v380_v1, %v60_v40  ;;  %v74_v40 = vld [vmem:[%s896_s0 + $0x1e0] sm:$0xff]  ;;  %v75_v41 = vld [vmem:[%s896_s0 + $0x1e8] sm:$0xff] }
  0x25   :  { %322 = vst [vmem:[%s899_s3 + $0x130] sm:$0xff] %v258_v43  ;;  %323 = vst [vmem:[%s899_s3 + $0x138] sm:$0xff] %v259_v46  ;;  %v197_v54 = vadd.f32 %v385_v2, %v126_v47  ;;  %v198_v55 = vadd.f32 %v385_v2, %v127_v48  ;;  %v199_v56 = vadd.f32 %v385_v2, %v128_v49  ;;  %v260_v59 = vmax.f32 %v196_v50, 0.0  ;;  %v76_v42 = vld [vmem:[%s896_s0 + $0x1f0] sm:$0xff]  ;;  %v77_v47 = vld [vmem:[%s896_s0 + $0x1f8] sm:$0xff] }
  0x26   :  { %v132_v57 = vmul.f32 %v380_v1, %v61_v45  ;;  %v200_v60 = vadd.f32 %v385_v2, %v129_v51  ;;  %v201_v61 = vadd.f32 %v385_v2, %v130_v52  ;;  %v202_v62 = vadd.f32 %v385_v2, %v131_v53 }
  0x27   :  { %v261_v4 = vmax.f32 %v197_v54, 0.0  ;;  %v262_v5 = vmax.f32 %v198_v55, 0.0  ;;  %v263_v6 = vmax.f32 %v199_v56, 0.0  ;;  %324 = vst [vmem:[%s899_s3 + $0x140] sm:$0xff] %v260_v59  ;;  %v133_v14 = vmul.f32 %v380_v1, %v62_v58 }
  0x28   :  { %v203_v7 = vadd.f32 %v385_v2, %v132_v57  ;;  %v264_v11 = vmax.f32 %v200_v60, 0.0  ;;  %v265_v12 = vmax.f32 %v201_v61, 0.0  ;;  %v266_v13 = vmax.f32 %v202_v62, 0.0 }
  0x29   :  { %325 = vst [vmem:[%s899_s3 + $0x148] sm:$0xff] %v261_v4  ;;  %326 = vst [vmem:[%s899_s3 + $0x150] sm:$0xff] %v262_v5  ;;  %v134_v17 = vmul.f32 %v380_v1, %v63_v63  ;;  %v135_v18 = vmul.f32 %v380_v1, %v64_v0  ;;  %v136_v19 = vmul.f32 %v380_v1, %v65_v3 }
  0x2a   :  { %327 = vst [vmem:[%s899_s3 + $0x158] sm:$0xff] %v263_v6  ;;  %v267_v16 = vmax.f32 %v203_v7, 0.0  ;;  %328 = vst [vmem:[%s899_s3 + $0x160] sm:$0xff] %v264_v11  ;;  %v204_v20 = vadd.f32 %v385_v2, %v133_v14  ;;  %v137_v21 = vmul.f32 %v380_v1, %v66_v8  ;;  %v138_v22 = vmul.f32 %v380_v1, %v67_v9 }
  0x2b   :  { %329 = vst [vmem:[%s899_s3 + $0x168] sm:$0xff] %v265_v12  ;;  %330 = vst [vmem:[%s899_s3 + $0x170] sm:$0xff] %v266_v13  ;;  %v139_v23 = vmul.f32 %v380_v1, %v68_v10  ;;  %v205_v24 = vadd.f32 %v385_v2, %v134_v17  ;;  %v206_v25 = vadd.f32 %v385_v2, %v135_v18 }
  0x2c   :  { %331 = vst [vmem:[%s899_s3 + $0x178] sm:$0xff] %v267_v16  ;;  %v207_v26 = vadd.f32 %v385_v2, %v136_v19  ;;  %v140_v27 = vmul.f32 %v380_v1, %v69_v15  ;;  %v268_v29 = vmax.f32 %v204_v20, 0.0  ;;  %v208_v30 = vadd.f32 %v385_v2, %v137_v21 }
  0x2d   :  { %v209_v31 = vadd.f32 %v385_v2, %v138_v22  ;;  %v210_v32 = vadd.f32 %v385_v2, %v139_v23  ;;  %v269_v36 = vmax.f32 %v205_v24, 0.0  ;;  %v270_v37 = vmax.f32 %v206_v25, 0.0 }
  0x2e   :  { %v271_v38 = vmax.f32 %v207_v26, 0.0  ;;  %v211_v39 = vadd.f32 %v385_v2, %v140_v27  ;;  %332 = vst [vmem:[%s899_s3 + $0x180] sm:$0xff] %v268_v29  ;;  %v272_v43 = vmax.f32 %v208_v30, 0.0  ;;  %v141_v46 = vmul.f32 %v380_v1, %v70_v28 }
  0x2f   :  { %v273_v44 = vmax.f32 %v209_v31, 0.0  ;;  %v274_v45 = vmax.f32 %v210_v32, 0.0  ;;  %333 = vst [vmem:[%s899_s3 + $0x188] sm:$0xff] %v269_v36  ;;  %334 = vst [vmem:[%s899_s3 + $0x190] sm:$0xff] %v270_v37  ;;  %v142_v49 = vmul.f32 %v380_v1, %v71_v33  ;;  %v143_v50 = vmul.f32 %v380_v1, %v72_v34 }
  0x30   :  { %335 = vst [vmem:[%s899_s3 + $0x198] sm:$0xff] %v271_v38  ;;  %v275_v48 = vmax.f32 %v211_v39, 0.0  ;;  %v144_v51 = vmul.f32 %v380_v1, %v73_v35  ;;  %336 = vst [vmem:[%s899_s3 + $0x1a0] sm:$0xff] %v272_v43  ;;  %v212_v52 = vadd.f32 %v385_v2, %v141_v46  ;;  %v145_v53 = vmul.f32 %v380_v1, %v74_v40 }
  0x31   :  { %337 = vst [vmem:[%s899_s3 + $0x1a8] sm:$0xff] %v273_v44  ;;  %338 = vst [vmem:[%s899_s3 + $0x1b0] sm:$0xff] %v274_v45  ;;  %v146_v54 = vmul.f32 %v380_v1, %v75_v41  ;;  %v147_v55 = vmul.f32 %v380_v1, %v76_v42  ;;  %v213_v56 = vadd.f32 %v385_v2, %v142_v49 }
  0x32   :  { %339 = vst [vmem:[%s899_s3 + $0x1b8] sm:$0xff] %v275_v48  ;;  %v214_v57 = vadd.f32 %v385_v2, %v143_v50  ;;  %v215_v58 = vadd.f32 %v385_v2, %v144_v51  ;;  %v148_v59 = vmul.f32 %v380_v1, %v77_v47  ;;  %v276_v60 = vmax.f32 %v212_v52, 0.0 }
  0x33   :  { %v216_v61 = vadd.f32 %v385_v2, %v145_v53  ;;  %v217_v62 = vadd.f32 %v385_v2, %v146_v54  ;;  %v218_v63 = vadd.f32 %v385_v2, %v147_v55  ;;  %v277_v0 = vmax.f32 %v213_v56, 0.0 }
  0x34   :  { %v278_v3 = vmax.f32 %v214_v57, 0.0  ;;  %v279_v4 = vmax.f32 %v215_v58, 0.0  ;;  %v219_v5 = vadd.f32 %v385_v2, %v148_v59  ;;  %340 = vst [vmem:[%s899_s3 + $0x1c0] sm:$0xff] %v276_v60 }
  0x35   :  { %v280_v6 = vmax.f32 %v216_v61, 0.0  ;;  %v281_v7 = vmax.f32 %v217_v62, 0.0  ;;  %v282_v8 = vmax.f32 %v218_v63, 0.0  ;;  %341 = vst [vmem:[%s899_s3 + $0x1c8] sm:$0xff] %v277_v0 }
  0x36   :  { %342 = vst [vmem:[%s899_s3 + $0x1d0] sm:$0xff] %v278_v3  ;;  %343 = vst [vmem:[%s899_s3 + $0x1d8] sm:$0xff] %v279_v4  ;;  %v283_v1 = vmax.f32 %v219_v5, 0.0 }
  0x37   :  { %344 = vst [vmem:[%s899_s3 + $0x1e0] sm:$0xff] %v280_v6  ;;  %345 = vst [vmem:[%s899_s3 + $0x1e8] sm:$0xff] %v281_v7 }
  0x38   :  { %346 = vst [vmem:[%s899_s3 + $0x1f0] sm:$0xff] %v282_v8  ;;  %347 = vst [vmem:[%s899_s3 + $0x1f8] sm:$0xff] %v283_v1 }

// kernel: conv_bn_relu.2
= control target key start
LH: loop header
LB: loop body
LE: loop exit
PB: predicated region body
PF: predicated region fallthrough
CT: control target
= control target key end

     0   :  { %v1117_v40 = vmov 0.0   ;;  %s1651_s1 = inlined_call_operand.vmem [shape: bf16[128,128], index: 1, kind: input, shape index: {}]   ;;  %s1652_s0 = inlined_call_operand.vmem [shape: bf16[512,128], index: 0, kind: input, shape index: {}]   ;;  %s1653_s3 = inlined_call_operand.vmem [shape: f32[8,128], index: 3, kind: output, shape index: {1}]   ;;  %s1654_s2 = inlined_call_operand.vmem [shape: f32[512,128], index: 2, kind: output, shape index: {0}]  }
   0x1   :  { %v1077_v0 = vld [vmem:[%s1651_s1] sm:$0xff]   ;;  %v1078_v1 = vld [vmem:[%s1651_s1 + $0x8] sm:$0xff]   ;;  %v1079_v2 = vld [vmem:[%s1651_s1 + $0x10] sm:$0xff]   ;;  %687 = vst [vmem:[%s1653_s3] sm:$0xff] %v1117_v40 }
   0x2   :  { %980 = vmatprep.subr.bf16.mxu0 %v1077_v0  ;;  %1060 = vmatprep.subr.bf16.mxu1 %v1077_v0  ;;  %v1080_v3 = vld [vmem:[%s1651_s1 + $0x18] sm:$0xff]   ;;  %v1085_v4 = vld [vmem:[%s1652_s0] sm:$0xff]   ;;  %v1082_v6 = vld [vmem:[%s1651_s1 + $0x28] sm:$0xff]  }
   0x3   :  { %981 = vmatpush3.bf16.msra.mxu0 %v1077_v0  ;;  %1068 = vmatpush3.bf16.msra.mxu1 %v1077_v0  ;;  %v1081_v5 = vld [vmem:[%s1651_s1 + $0x20] sm:$0xff]   ;;  %v1083_v7 = vld [vmem:[%s1651_s1 + $0x30] sm:$0xff]   ;;  %v1084_v8 = vld [vmem:[%s1651_s1 + $0x38] sm:$0xff]  }
   0x4   :  { %982 = vmatprep.subr.bf16.mxu0 %v1078_v1  ;;  %1061 = vmatprep.subr.bf16.mxu1 %v1078_v1  ;;  %v1101_v9 = vld [vmem:[%s1652_s0 + $0x80] sm:$0xff]   ;;  %v1086_v10 = vld [vmem:[%s1652_s0 + $0x8] sm:$0xff]   ;;  %v1087_v11 = vld [vmem:[%s1652_s0 + $0x10] sm:$0xff]  }
   0x5   :  { %996 = vmatprep.mubr.bf16.mxu0 %v1085_v4  ;;  %1028 = vmatprep.mubr.bf16.mxu1 %v1101_v9  ;;  %v1102_v12 = vld [vmem:[%s1652_s0 + $0x88] sm:$0xff]   ;;  %v1103_v13 = vld [vmem:[%s1652_s0 + $0x90] sm:$0xff]   ;;  %v1088_v14 = vld [vmem:[%s1652_s0 + $0x18] sm:$0xff]  }
   0x6   :  { %v1089_v15 = vld [vmem:[%s1652_s0 + $0x20] sm:$0xff]   ;;  %v1104_v16 = vld [vmem:[%s1652_s0 + $0x98] sm:$0xff]   ;;  %v1090_v18 = vld [vmem:[%s1652_s0 + $0x28] sm:$0xff]  }
   0x7   :  { %983 = vmatpush3.bf16.msra.mxu0 %v1078_v1  ;;  %1069 = vmatpush3.bf16.msra.mxu1 %v1078_v1  ;;  %v1105_v17 = vld [vmem:[%s1652_s0 + $0xa0] sm:$0xff]   ;;  %v1106_v19 = vld [vmem:[%s1652_s0 + $0xa8] sm:$0xff]   ;;  %v1091_v20 = vld [vmem:[%s1652_s0 + $0x30] sm:$0xff]  }
   0x8   :  { %984 = vmatprep.subr.bf16.mxu0 %v1079_v2  ;;  %1062 = vmatprep.subr.bf16.mxu1 %v1079_v2  ;;  %v1107_v21 = vld [vmem:[%s1652_s0 + $0xb0] sm:$0xff]   ;;  %v1092_v22 = vld [vmem:[%s1652_s0 + $0x38] sm:$0xff]   ;;  %v1093_v24 = vld [vmem:[%s1652_s0 + $0x40] sm:$0xff]  }
   0x9   :  { %v1108_v23 = vld [vmem:[%s1652_s0 + $0xb8] sm:$0xff]   ;;  %v1109_v25 = vld [vmem:[%s1652_s0 + $0xc0] sm:$0xff]   ;;  %v1094_v26 = vld [vmem:[%s1652_s0 + $0x48] sm:$0xff]  }
   0xa   :  { %v1110_v27 = vld [vmem:[%s1652_s0 + $0xc8] sm:$0xff]   ;;  %v1095_v28 = vld [vmem:[%s1652_s0 + $0x50] sm:$0xff]   ;;  %v1096_v30 = vld [vmem:[%s1652_s0 + $0x58] sm:$0xff]  }
   0xb   :  { %985 = vmatpush3.bf16.msra.mxu0 %v1079_v2  ;;  %1070 = vmatpush3.bf16.msra.mxu1 %v1079_v2  ;;  %v1111_v29 = vld [vmem:[%s1652_s0 + $0xd0] sm:$0xff]   ;;  %v1112_v31 = vld [vmem:[%s1652_s0 + $0xd8] sm:$0xff]   ;;  %v1097_v32 = vld [vmem:[%s1652_s0 + $0x60] sm:$0xff]  }
   0xc   :  { %986 = vmatprep.subr.bf16.mxu0 %v1080_v3  ;;  %1063 = vmatprep.subr.bf16.mxu1 %v1080_v3  ;;  %v1113_v33 = vld [vmem:[%s1652_s0 + $0xe0] sm:$0xff]   ;;  %v1098_v34 = vld [vmem:[%s1652_s0 + $0x68] sm:$0xff]   ;;  %v1099_v36 = vld [vmem:[%s1652_s0 + $0x70] sm:$0xff]  }
   0xd   :  { %v1114_v35 = vld [vmem:[%s1652_s0 + $0xe8] sm:$0xff]   ;;  %v1115_v37 = vld [vmem:[%s1652_s0 + $0xf0] sm:$0xff]   ;;  %v1100_v38 = vld [vmem:[%s1652_s0 + $0x78] sm:$0xff]  }
   0xe   :  { %v1116_v39 = vld [vmem:[%s1652_s0 + $0xf8] sm:$0xff]  }
   0xf   :  { %987 = vmatpush3.bf16.msra.mxu0 %v1080_v3  ;;  %1071 = vmatpush3.bf16.msra.mxu1 %v1080_v3 }
  0x10   :  { %988 = vmatprep.subr.bf16.mxu0 %v1081_v5  ;;  %1064 = vmatprep.subr.bf16.mxu1 %v1081_v5 }
  0x13   :  { %989 = vmatpush3.bf16.msra.mxu0 %v1081_v5  ;;  %1072 = vmatpush3.bf16.msra.mxu1 %v1081_v5 }
  0x14   :  { %990 = vmatprep.subr.bf16.mxu0 %v1082_v6  ;;  %1065 = vmatprep.subr.bf16.mxu1 %v1082_v6 }
  0x17   :  { %991 = vmatpush3.bf16.msra.mxu0 %v1082_v6  ;;  %1073 = vmatpush3.bf16.msra.mxu1 %v1082_v6 }
  0x18   :  { %992 = vmatprep.subr.bf16.mxu0 %v1083_v7  ;;  %1066 = vmatprep.subr.bf16.mxu1 %v1083_v7 }
  0x1b   :  { %993 = vmatpush3.bf16.msra.mxu0 %v1083_v7  ;;  %1074 = vmatpush3.bf16.msra.mxu1 %v1083_v7 }
  0x1c   :  { %994 = vmatprep.subr.bf16.mxu0 %v1084_v8  ;;  %1067 = vmatprep.subr.bf16.mxu1 %v1084_v8 }
  0x1f   :  { %995 = vmatpush3.bf16.msra.mxu0 %v1084_v8  ;;  %1075 = vmatpush3.bf16.msra.mxu1 %v1084_v8 }
  0x22   :  { %997 = vmatmul.mubr.bf16.vlgmr.msra.gmra.mrb[0].mxu0 %v1086_v10  ;;  %1029 = vmatmul.mubr.bf16.vlgmr.msra.gmra.mrb[0].mxu1 %v1102_v12 }
  0x23   :  { %1000 = vmatprep.mubr.bf16.mxu0 %v1087_v11  ;;  %1032 = vmatprep.mubr.bf16.mxu1 %v1103_v13 }
  0x2a   :  { %1001 = vmatmul.mubr.bf16.gmra.mrb[4].mxu0 %v1088_v14  ;;  %1033 = vmatmul.mubr.bf16.gmra.mrb[4].mxu1 %v1104_v16 }
  0x2b   :  { %1004 = vmatprep.mubr.bf16.mxu0 %v1089_v15  ;;  %1036 = vmatprep.mubr.bf16.mxu1 %v1105_v17 }
  0x32   :  { %1005 = vmatmul.mubr.bf16.gmra.mrb[8].mxu0 %v1090_v18  ;;  %1037 = vmatmul.mubr.bf16.gmra.mrb[8].mxu1 %v1106_v19 }
  0x33   :  { %1008 = vmatprep.mubr.bf16.mxu0 %v1091_v20  ;;  %1040 = vmatprep.mubr.bf16.mxu1 %v1107_v21 }
  0x3a   :  { %1009 = vmatmul.mubr.bf16.gmra.mrb[12].mxu0 %v1092_v22  ;;  %1041 = vmatmul.mubr.bf16.gmra.mrb[12].mxu1 %v1108_v23 }
  0x3b   :  { %1012 = vmatprep.mubr.bf16.mxu0 %v1093_v24  ;;  %1044 = vmatprep.mubr.bf16.mxu1 %v1109_v25 }
  0x42   :  { %1013 = vmatmul.mubr.bf16.gmra.mrb[16].mxu0 %v1094_v26  ;;  %1045 = vmatmul.mubr.bf16.gmra.mrb[16].mxu1 %v1110_v27 }
  0x43   :  { %1016 = vmatprep.mubr.bf16.mxu0 %v1095_v28  ;;  %1048 = vmatprep.mubr.bf16.mxu1 %v1111_v29 }
  0x4a   :  { %1017 = vmatmul.mubr.bf16.gmra.mrb[20].mxu0 %v1096_v30  ;;  %1049 = vmatmul.mubr.bf16.gmra.mrb[20].mxu1 %v1112_v31 }
  0x4b   :  { %1020 = vmatprep.mubr.bf16.mxu0 %v1097_v32  ;;  %1052 = vmatprep.mubr.bf16.mxu1 %v1113_v33 }
  0x52   :  { %1021 = vmatmul.mubr.bf16.gmra.mrb[24].mxu0 %v1098_v34  ;;  %1053 = vmatmul.mubr.bf16.gmra.mrb[24].mxu1 %v1114_v35 }
  0x53   :  { %1024 = vmatprep.mubr.bf16.mxu0 %v1099_v36  ;;  %1056 = vmatprep.mubr.bf16.mxu1 %v1115_v37 }
  0x5a   :  { %1025 = vmatmul.mubr.bf16.gmra.mrb[28].mxu0 %v1100_v38  ;;  %1057 = vmatmul.mubr.bf16.gmra.mrb[28].mxu1 %v1116_v39 }
  0xf5   :  { %v998_v41 = vpop.f32.mrb[0].mxu0  ;;  %v1261_v42 = vpop.f32.mrb[0].mxu1 }
  0xf6   :  { %625 = vst [vmem:[%s1654_s2 + $0x10] sm:$0xff] %v998_v41  ;;  %v368_v43 = vpop.f32.mrb[1].mxu0  ;;  %657 = vst [vmem:[%s1654_s2 + $0x110] sm:$0xff] %v1261_v42  ;;  %v1270_v44 = vpop.f32.mrb[1].mxu1  ;;  %v760_v52 = vmul.f32 %v998_v41, %v998_v41 }
  0xf7   :  { %623 = vst [vmem:[%s1654_s2] sm:$0xff] %v368_v43  ;;  %v999_v45 = vpop.f32.mrb[2].mxu0  ;;  %655 = vst [vmem:[%s1654_s2 + $0x100] sm:$0xff] %v1270_v44  ;;  %v1279_v46 = vpop.f32.mrb[2].mxu1  ;;  %v758_v49 = vmul.f32 %v368_v43, %v368_v43 }
  0xf8   :  { %626 = vst [vmem:[%s1654_s2 + $0x18] sm:$0xff] %v999_v45  ;;  %v371_v47 = vpop.f32.mrb[3].mxu0  ;;  %658 = vst [vmem:[%s1654_s2 + $0x118] sm:$0xff] %v1279_v46  ;;  %v1288_v48 = vpop.f32.mrb[3].mxu1  ;;  %v761_v55 = vmul.f32 %v999_v45, %v999_v45 }
  0xf9   :  { %624 = vst [vmem:[%s1654_s2 + $0x8] sm:$0xff] %v371_v47  ;;  %v688_v50 = vadd.f32 %v371_v47, %v368_v43  ;;  %v759_v51 = vmul.f32 %v371_v47, %v371_v47  ;;  %656 = vst [vmem:[%s1654_s2 + $0x108] sm:$0xff] %v1288_v48 }
  0xfb   :  { %v689_v53 = vadd.f32 %v998_v41, %v688_v50  ;;  %v822_v54 = vadd.f32 %v759_v51, %v758_v49 }
  0xfd   :  { %v823_v56 = vadd.f32 %v822_v54, %v760_v52  ;;  %v1002_v57 = vpop.f32.mrb[4].mxu0  ;;  %v690_v58 = vadd.f32 %v999_v45, %v689_v53  ;;  %v1297_v59 = vpop.f32.mrb[4].mxu1 }
  0xfe   :  { %629 = vst [vmem:[%s1654_s2 + $0x30] sm:$0xff] %v1002_v57  ;;  %v384_v60 = vpop.f32.mrb[5].mxu0  ;;  %661 = vst [vmem:[%s1654_s2 + $0x130] sm:$0xff] %v1297_v59  ;;  %v1306_v61 = vpop.f32.mrb[5].mxu1  ;;  %v764_v8 = vmul.f32 %v1002_v57, %v1002_v57 }
  0xff   :  { %627 = vst [vmem:[%s1654_s2 + $0x20] sm:$0xff] %v384_v60  ;;  %v691_v62 = vadd.f32 %v690_v58, %v384_v60  ;;  %v762_v63 = vmul.f32 %v384_v60, %v384_v60  ;;  %v824_v0 = vadd.f32 %v823_v56, %v761_v55  ;;  %v1003_v1 = vpop.f32.mrb[6].mxu0  ;;  %659 = vst [vmem:[%s1654_s2 + $0x120] sm:$0xff] %v1306_v61  ;;  %v1315_v2 = vpop.f32.mrb[6].mxu1 }
 0x100   :  { %630 = vst [vmem:[%s1654_s2 + $0x38] sm:$0xff] %v1003_v1  ;;  %v387_v3 = vpop.f32.mrb[7].mxu0  ;;  %662 = vst [vmem:[%s1654_s2 + $0x138] sm:$0xff] %v1315_v2  ;;  %v1324_v4 = vpop.f32.mrb[7].mxu1  ;;  %v765_v11 = vmul.f32 %v1003_v1, %v1003_v1 }
 0x101   :  { %v825_v5 = vadd.f32 %v824_v0, %v762_v63  ;;  %628 = vst [vmem:[%s1654_s2 + $0x28] sm:$0xff] %v387_v3  ;;  %v692_v6 = vadd.f32 %v691_v62, %v387_v3  ;;  %v763_v7 = vmul.f32 %v387_v3, %v387_v3  ;;  %660 = vst [vmem:[%s1654_s2 + $0x128] sm:$0xff] %v1324_v4 }
 0x103   :  { %v693_v9 = vadd.f32 %v1002_v57, %v692_v6  ;;  %v826_v10 = vadd.f32 %v825_v5, %v763_v7 }
 0x105   :  { %v827_v12 = vadd.f32 %v826_v10, %v764_v8  ;;  %v1006_v13 = vpop.f32.mrb[8].mxu0  ;;  %v694_v14 = vadd.f32 %v1003_v1, %v693_v9  ;;  %v1333_v15 = vpop.f32.mrb[8].mxu1 }
 0x106   :  { %633 = vst [vmem:[%s1654_s2 + $0x50] sm:$0xff] %v1006_v13  ;;  %v400_v16 = vpop.f32.mrb[9].mxu0  ;;  %665 = vst [vmem:[%s1654_s2 + $0x150] sm:$0xff] %v1333_v15  ;;  %v1342_v17 = vpop.f32.mrb[9].mxu1  ;;  %v768_v28 = vmul.f32 %v1006_v13, %v1006_v13 }
 0x107   :  { %631 = vst [vmem:[%s1654_s2 + $0x40] sm:$0xff] %v400_v16  ;;  %v695_v18 = vadd.f32 %v694_v14, %v400_v16  ;;  %v766_v19 = vmul.f32 %v400_v16, %v400_v16  ;;  %v828_v20 = vadd.f32 %v827_v12, %v765_v11  ;;  %v1007_v21 = vpop.f32.mrb[10].mxu0  ;;  %663 = vst [vmem:[%s1654_s2 + $0x140] sm:$0xff] %v1342_v17  ;;  %v1351_v22 = vpop.f32.mrb[10].mxu1 }
 0x108   :  { %634 = vst [vmem:[%s1654_s2 + $0x58] sm:$0xff] %v1007_v21  ;;  %v403_v23 = vpop.f32.mrb[11].mxu0  ;;  %666 = vst [vmem:[%s1654_s2 + $0x158] sm:$0xff] %v1351_v22  ;;  %v1360_v24 = vpop.f32.mrb[11].mxu1  ;;  %v769_v31 = vmul.f32 %v1007_v21, %v1007_v21 }
 0x109   :  { %v829_v25 = vadd.f32 %v828_v20, %v766_v19  ;;  %632 = vst [vmem:[%s1654_s2 + $0x48] sm:$0xff] %v403_v23  ;;  %v696_v26 = vadd.f32 %v695_v18, %v403_v23  ;;  %v767_v27 = vmul.f32 %v403_v23, %v403_v23  ;;  %664 = vst [vmem:[%s1654_s2 + $0x148] sm:$0xff] %v1360_v24 }
 0x10b   :  { %v697_v29 = vadd.f32 %v1006_v13, %v696_v26  ;;  %v830_v30 = vadd.f32 %v829_v25, %v767_v27 }
 0x10d   :  { %v831_v32 = vadd.f32 %v830_v30, %v768_v28  ;;  %v1010_v33 = vpop.f32.mrb[12].mxu0  ;;  %v698_v34 = vadd.f32 %v1007_v21, %v697_v29  ;;  %v1369_v35 = vpop.f32.mrb[12].mxu1 }
 0x10e   :  { %637 = vst [vmem:[%s1654_s2 + $0x70] sm:$0xff] %v1010_v33  ;;  %v416_v36 = vpop.f32.mrb[13].mxu0  ;;  %669 = vst [vmem:[%s1654_s2 + $0x170] sm:$0xff] %v1369_v35  ;;  %v1378_v37 = vpop.f32.mrb[13].mxu1  ;;  %v772_v52 = vmul.f32 %v1010_v33, %v1010_v33 }
 0x10f   :  { %635 = vst [vmem:[%s1654_s2 + $0x60] sm:$0xff] %v416_v36  ;;  %v699_v38 = vadd.f32 %v698_v34, %v416_v36  ;;  %v770_v39 = vmul.f32 %v416_v36, %v416_v36  ;;  %v832_v40 = vadd.f32 %v831_v32, %v769_v31  ;;  %v1011_v41 = vpop.f32.mrb[14].mxu0  ;;  %667 = vst [vmem:[%s1654_s2 + $0x160] sm:$0xff] %v1378_v37  ;;  %v1387_v43 = vpop.f32.mrb[14].mxu1 }
 0x110   :  { %638 = vst [vmem:[%s1654_s2 + $0x78] sm:$0xff] %v1011_v41  ;;  %v419_v45 = vpop.f32.mrb[15].mxu0  ;;  %670 = vst [vmem:[%s1654_s2 + $0x178] sm:$0xff] %v1387_v43  ;;  %v1396_v47 = vpop.f32.mrb[15].mxu1  ;;  %v773_v55 = vmul.f32 %v1011_v41, %v1011_v41 }
 0x111   :  { %v833_v49 = vadd.f32 %v832_v40, %v770_v39  ;;  %636 = vst [vmem:[%s1654_s2 + $0x68] sm:$0xff] %v419_v45  ;;  %v700_v50 = vadd.f32 %v699_v38, %v419_v45  ;;  %v771_v51 = vmul.f32 %v419_v45, %v419_v45  ;;  %668 = vst [vmem:[%s1654_s2 + $0x168] sm:$0xff] %v1396_v47 }
 0x113   :  { %v701_v53 = vadd.f32 %v1010_v33, %v700_v50  ;;  %v834_v54 = vadd.f32 %v833_v49, %v771_v51 }
 0x115   :  { %v835_v56 = vadd.f32 %v834_v54, %v772_v52  ;;  %v1014_v57 = vpop.f32.mrb[16].mxu0  ;;  %v702_v58 = vadd.f32 %v1011_v41, %v701_v53  ;;  %v1405_v60 = vpop.f32.mrb[16].mxu1 }
 0x116   :  { %641 = vst [vmem:[%s1654_s2 + $0x90] sm:$0xff] %v1014_v57  ;;  %v432_v62 = vpop.f32.mrb[17].mxu0  ;;  %673 = vst [vmem:[%s1654_s2 + $0x190] sm:$0xff] %v1405_v60  ;;  %v1414_v63 = vpop.f32.mrb[17].mxu1  ;;  %v776_v12 = vmul.f32 %v1014_v57, %v1014_v57 }
 0x117   :  { %639 = vst [vmem:[%s1654_s2 + $0x80] sm:$0xff] %v432_v62  ;;  %v703_v0 = vadd.f32 %v702_v58, %v432_v62  ;;  %v774_v1 = vmul.f32 %v432_v62, %v432_v62  ;;  %v836_v3 = vadd.f32 %v835_v56, %v773_v55  ;;  %v1015_v5 = vpop.f32.mrb[18].mxu0  ;;  %671 = vst [vmem:[%s1654_s2 + $0x180] sm:$0xff] %v1414_v63  ;;  %v1423_v6 = vpop.f32.mrb[18].mxu1 }
 0x118   :  { %642 = vst [vmem:[%s1654_s2 + $0x98] sm:$0xff] %v1015_v5  ;;  %v435_v7 = vpop.f32.mrb[19].mxu0  ;;  %674 = vst [vmem:[%s1654_s2 + $0x198] sm:$0xff] %v1423_v6  ;;  %v1432_v8 = vpop.f32.mrb[19].mxu1  ;;  %v777_v16 = vmul.f32 %v1015_v5, %v1015_v5 }
 0x119   :  { %v837_v9 = vadd.f32 %v836_v3, %v774_v1  ;;  %640 = vst [vmem:[%s1654_s2 + $0x88] sm:$0xff] %v435_v7  ;;  %v704_v10 = vadd.f32 %v703_v0, %v435_v7  ;;  %v775_v11 = vmul.f32 %v435_v7, %v435_v7  ;;  %672 = vst [vmem:[%s1654_s2 + $0x188] sm:$0xff] %v1432_v8 }
 0x11b   :  { %v705_v13 = vadd.f32 %v1014_v57, %v704_v10  ;;  %v838_v14 = vadd.f32 %v837_v9, %v775_v11 }
 0x11d   :  { %v839_v18 = vadd.f32 %v838_v14, %v776_v12  ;;  %v1018_v19 = vpop.f32.mrb[20].mxu0  ;;  %v706_v20 = vadd.f32 %v1015_v5, %v705_v13  ;;  %v1441_v21 = vpop.f32.mrb[20].mxu1 }
 0x11e   :  { %645 = vst [vmem:[%s1654_s2 + $0xb0] sm:$0xff] %v1018_v19  ;;  %v448_v23 = vpop.f32.mrb[21].mxu0  ;;  %677 = vst [vmem:[%s1654_s2 + $0x1b0] sm:$0xff] %v1441_v21  ;;  %v1450_v25 = vpop.f32.mrb[21].mxu1  ;;  %v780_v38 = vmul.f32 %v1018_v19, %v1018_v19 }
 0x11f   :  { %643 = vst [vmem:[%s1654_s2 + $0xa0] sm:$0xff] %v448_v23  ;;  %v707_v26 = vadd.f32 %v706_v20, %v448_v23  ;;  %v778_v27 = vmul.f32 %v448_v23, %v448_v23  ;;  %v840_v28 = vadd.f32 %v839_v18, %v777_v16  ;;  %v1019_v29 = vpop.f32.mrb[22].mxu0  ;;  %675 = vst [vmem:[%s1654_s2 + $0x1a0] sm:$0xff] %v1450_v25  ;;  %v1459_v30 = vpop.f32.mrb[22].mxu1 }
 0x120   :  { %646 = vst [vmem:[%s1654_s2 + $0xb8] sm:$0xff] %v1019_v29  ;;  %v451_v31 = vpop.f32.mrb[23].mxu0  ;;  %678 = vst [vmem:[%s1654_s2 + $0x1b8] sm:$0xff] %v1459_v30  ;;  %v1468_v32 = vpop.f32.mrb[23].mxu1  ;;  %v781_v41 = vmul.f32 %v1019_v29, %v1019_v29 }
 0x121   :  { %v841_v33 = vadd.f32 %v840_v28, %v778_v27  ;;  %644 = vst [vmem:[%s1654_s2 + $0xa8] sm:$0xff] %v451_v31  ;;  %v708_v34 = vadd.f32 %v707_v26, %v451_v31  ;;  %v779_v36 = vmul.f32 %v451_v31, %v451_v31  ;;  %676 = vst [vmem:[%s1654_s2 + $0x1a8] sm:$0xff] %v1468_v32 }
 0x123   :  { %v709_v39 = vadd.f32 %v1018_v19, %v708_v34  ;;  %v842_v40 = vadd.f32 %v841_v33, %v779_v36 }
 0x125   :  { %v843_v45 = vadd.f32 %v842_v40, %v780_v38  ;;  %v1022_v49 = vpop.f32.mrb[24].mxu0  ;;  %v710_v50 = vadd.f32 %v1019_v29, %v709_v39  ;;  %v1477_v51 = vpop.f32.mrb[24].mxu1 }
 0x126   :  { %649 = vst [vmem:[%s1654_s2 + $0xd0] sm:$0xff] %v1022_v49  ;;  %v464_v52 = vpop.f32.mrb[25].mxu0  ;;  %681 = vst [vmem:[%s1654_s2 + $0x1d0] sm:$0xff] %v1477_v51  ;;  %v1486_v53 = vpop.f32.mrb[25].mxu1  ;;  %v784_v7 = vmul.f32 %v1022_v49, %v1022_v49 }
 0x127   :  { %647 = vst [vmem:[%s1654_s2 + $0xc0] sm:$0xff] %v464_v52  ;;  %v711_v54 = vadd.f32 %v710_v50, %v464_v52  ;;  %v782_v55 = vmul.f32 %v464_v52, %v464_v52  ;;  %v844_v56 = vadd.f32 %v843_v45, %v781_v41  ;;  %v1023_v57 = vpop.f32.mrb[26].mxu0  ;;  %679 = vst [vmem:[%s1654_s2 + $0x1c0] sm:$0xff] %v1486_v53  ;;  %v1495_v58 = vpop.f32.mrb[26].mxu1 }
 0x128   :  { %650 = vst [vmem:[%s1654_s2 + $0xd8] sm:$0xff] %v1023_v57  ;;  %v467_v62 = vpop.f32.mrb[27].mxu0  ;;  %682 = vst [vmem:[%s1654_s2 + $0x1d8] sm:$0xff] %v1495_v58  ;;  %v1504_v0 = vpop.f32.mrb[27].mxu1  ;;  %v785_v11 = vmul.f32 %v1023_v57, %v1023_v57  ;;  %v790_v50 = vmul.f32 %v1270_v44, %v1270_v44 }
 0x129   :  { %v845_v1 = vadd.f32 %v844_v56, %v782_v55  ;;  %648 = vst [vmem:[%s1654_s2 + $0xc8] sm:$0xff] %v467_v62  ;;  %v712_v3 = vadd.f32 %v711_v54, %v467_v62  ;;  %v783_v5 = vmul.f32 %v467_v62, %v467_v62  ;;  %680 = vst [vmem:[%s1654_s2 + $0x1c8] sm:$0xff] %v1504_v0 }
 0x12a   :  { %v792_v62 = vmul.f32 %v1261_v42, %v1261_v42 }
 0x12b   :  { %v713_v9 = vadd.f32 %v1022_v49, %v712_v3  ;;  %v846_v10 = vadd.f32 %v845_v1, %v783_v5  ;;  %v793_v5 = vmul.f32 %v1279_v46, %v1279_v46 }
 0x12d   :  { %v847_v12 = vadd.f32 %v846_v10, %v784_v7  ;;  %v1026_v13 = vpop.f32.mrb[28].mxu0  ;;  %v714_v14 = vadd.f32 %v1023_v57, %v713_v9  ;;  %v1513_v16 = vpop.f32.mrb[28].mxu1  ;;  %v791_v57 = vmul.f32 %v1288_v48, %v1288_v48 }
 0x12e   :  { %653 = vst [vmem:[%s1654_s2 + $0xf0] sm:$0xff] %v1026_v13  ;;  %v480_v18 = vpop.f32.mrb[29].mxu0  ;;  %685 = vst [vmem:[%s1654_s2 + $0x1f0] sm:$0xff] %v1513_v16  ;;  %v1522_v19 = vpop.f32.mrb[29].mxu1  ;;  %v788_v38 = vmul.f32 %v1026_v13, %v1026_v13 }
 0x12f   :  { %651 = vst [vmem:[%s1654_s2 + $0xe0] sm:$0xff] %v480_v18  ;;  %v715_v20 = vadd.f32 %v714_v14, %v480_v18  ;;  %v786_v23 = vmul.f32 %v480_v18, %v480_v18  ;;  %v848_v26 = vadd.f32 %v847_v12, %v785_v11  ;;  %v1027_v27 = vpop.f32.mrb[30].mxu0  ;;  %683 = vst [vmem:[%s1654_s2 + $0x1e0] sm:$0xff] %v1522_v19  ;;  %v1531_v28 = vpop.f32.mrb[30].mxu1 }
 0x130   :  { %654 = vst [vmem:[%s1654_s2 + $0xf8] sm:$0xff] %v1027_v27  ;;  %v483_v29 = vpop.f32.mrb[31].mxu0  ;;  %686 = vst [vmem:[%s1654_s2 + $0x1f8] sm:$0xff] %v1531_v28  ;;  %v1540_v31 = vpop.f32.mrb[31].mxu1  ;;  %v789_v41 = vmul.f32 %v1027_v27, %v1027_v27 }
 0x131   :  { %v849_v33 = vadd.f32 %v848_v26, %v786_v23  ;;  %652 = vst [vmem:[%s1654_s2 + $0xe8] sm:$0xff] %v483_v29  ;;  %v716_v34 = vadd.f32 %v715_v20, %v483_v29  ;;  %v787_v36 = vmul.f32 %v483_v29, %v483_v29  ;;  %684 = vst [vmem:[%s1654_s2 + $0x1e8] sm:$0xff] %v1540_v31 }
 0x133   :  { %v717_v39 = vadd.f32 %v1026_v13, %v716_v34  ;;  %v850_v40 = vadd.f32 %v849_v33, %v787_v36  ;;  %v795_v13 = vmul.f32 %v1324_v4, %v1324_v4  ;;  %v799_v33 = vmul.f32 %v1360_v24, %v1360_v24 }
 0x135   :  { %v851_v45 = vadd.f32 %v850_v40, %v788_v38  ;;  %v718_v49 = vadd.f32 %v1027_v27, %v717_v39 }
 0x137   :  { %v719_v52 = vadd.f32 %v718_v49, %v1270_v44  ;;  %v852_v54 = vadd.f32 %v851_v45, %v789_v41  ;;  %v794_v44 = vmul.f32 %v1306_v61, %v1306_v61  ;;  %v803_v49 = vmul.f32 %v1396_v47, %v1396_v47 }
 0x139   :  { %v853_v55 = vadd.f32 %v852_v54, %v790_v50  ;;  %v720_v56 = vadd.f32 %v719_v52, %v1288_v48 }
 0x13b   :  { %v721_v1 = vadd.f32 %v1261_v42, %v720_v56  ;;  %v854_v3 = vadd.f32 %v853_v55, %v791_v57  ;;  %v796_v42 = vmul.f32 %v1297_v59, %v1297_v59 }
 0x13d   :  { %v855_v7 = vadd.f32 %v854_v3, %v792_v62  ;;  %v722_v9 = vadd.f32 %v1279_v46, %v721_v1  ;;  %v797_v46 = vmul.f32 %v1315_v2, %v1315_v2  ;;  %v807_v1 = vmul.f32 %v1432_v8, %v1432_v8 }
 0x13f   :  { %v723_v10 = vadd.f32 %v722_v9, %v1306_v61  ;;  %v856_v11 = vadd.f32 %v855_v7, %v793_v5  ;;  %v798_v61 = vmul.f32 %v1342_v17, %v1342_v17 }
 0x141   :  { %v857_v12 = vadd.f32 %v856_v11, %v794_v44  ;;  %v724_v48 = vadd.f32 %v723_v10, %v1324_v4 }
 0x143   :  { %v725_v14 = vadd.f32 %v1297_v59, %v724_v48  ;;  %v858_v18 = vadd.f32 %v857_v12, %v795_v13  ;;  %v800_v59 = vmul.f32 %v1333_v15, %v1333_v15  ;;  %v811_v12 = vmul.f32 %v1468_v32, %v1468_v32 }
 0x145   :  { %v859_v20 = vadd.f32 %v858_v18, %v796_v42  ;;  %v726_v23 = vadd.f32 %v1315_v2, %v725_v14  ;;  %v801_v2 = vmul.f32 %v1351_v22, %v1351_v22 }
 0x147   :  { %v727_v26 = vadd.f32 %v726_v23, %v1342_v17  ;;  %v860_v27 = vadd.f32 %v859_v20, %v797_v46  ;;  %v802_v17 = vmul.f32 %v1378_v37, %v1378_v37  ;;  %v815_v23 = vmul.f32 %v1504_v0, %v1504_v0 }
 0x149   :  { %v861_v29 = vadd.f32 %v860_v27, %v798_v61  ;;  %v728_v4 = vadd.f32 %v727_v26, %v1360_v24 }
 0x14b   :  { %v729_v34 = vadd.f32 %v1333_v15, %v728_v4  ;;  %v862_v36 = vadd.f32 %v861_v29, %v799_v33  ;;  %v804_v15 = vmul.f32 %v1369_v35, %v1369_v35 }
 0x14d   :  { %v863_v38 = vadd.f32 %v862_v36, %v800_v59  ;;  %v730_v39 = vadd.f32 %v1351_v22, %v729_v34  ;;  %v805_v22 = vmul.f32 %v1387_v43, %v1387_v43  ;;  %v819_v34 = vmul.f32 %v1540_v31, %v1540_v31 }
 0x14f   :  { %v731_v40 = vadd.f32 %v730_v39, %v1378_v37  ;;  %v864_v41 = vadd.f32 %v863_v38, %v801_v2  ;;  %v806_v37 = vmul.f32 %v1414_v63, %v1414_v63 }
 0x151   :  { %v865_v45 = vadd.f32 %v864_v41, %v802_v17  ;;  %v732_v24 = vadd.f32 %v731_v40, %v1396_v47 }
 0x153   :  { %v733_v50 = vadd.f32 %v1369_v35, %v732_v24  ;;  %v866_v52 = vadd.f32 %v865_v45, %v803_v49  ;;  %v808_v35 = vmul.f32 %v1405_v60, %v1405_v60 }
 0x155   :  { %v867_v54 = vadd.f32 %v866_v52, %v804_v15  ;;  %v734_v55 = vadd.f32 %v1387_v43, %v733_v50  ;;  %v809_v43 = vmul.f32 %v1423_v6, %v1423_v6 }
 0x157   :  { %v735_v56 = vadd.f32 %v734_v55, %v1414_v63  ;;  %v868_v57 = vadd.f32 %v867_v54, %v805_v22  ;;  %v810_v63 = vmul.f32 %v1450_v25, %v1450_v25 }
 0x159   :  { %v869_v62 = vadd.f32 %v868_v57, %v806_v37  ;;  %v736_v47 = vadd.f32 %v735_v56, %v1432_v8 }
 0x15b   :  { %v737_v3 = vadd.f32 %v1405_v60, %v736_v47  ;;  %v870_v5 = vadd.f32 %v869_v62, %v807_v1  ;;  %v812_v60 = vmul.f32 %v1441_v21, %v1441_v21 }
 0x15d   :  { %v871_v7 = vadd.f32 %v870_v5, %v808_v35  ;;  %v738_v9 = vadd.f32 %v1423_v6, %v737_v3  ;;  %v813_v6 = vmul.f32 %v1459_v30, %v1459_v30 }
 0x15f   :  { %v739_v44 = vadd.f32 %v738_v9, %v1450_v25  ;;  %v872_v10 = vadd.f32 %v871_v7, %v809_v43  ;;  %v814_v25 = vmul.f32 %v1486_v53, %v1486_v53 }
 0x161   :  { %v873_v11 = vadd.f32 %v872_v10, %v810_v63  ;;  %v740_v8 = vadd.f32 %v739_v44, %v1468_v32 }
 0x163   :  { %v741_v48 = vadd.f32 %v1441_v21, %v740_v8  ;;  %v874_v13 = vadd.f32 %v873_v11, %v811_v12  ;;  %v816_v21 = vmul.f32 %v1477_v51, %v1477_v51 }
 0x165   :  { %v875_v42 = vadd.f32 %v874_v13, %v812_v60  ;;  %v742_v14 = vadd.f32 %v1459_v30, %v741_v48  ;;  %v817_v30 = vmul.f32 %v1495_v58, %v1495_v58 }
 0x167   :  { %v743_v18 = vadd.f32 %v742_v14, %v1486_v53  ;;  %v876_v46 = vadd.f32 %v875_v42, %v813_v6  ;;  %v818_v53 = vmul.f32 %v1522_v19, %v1522_v19 }
 0x169   :  { %v877_v20 = vadd.f32 %v876_v46, %v814_v25  ;;  %v744_v32 = vadd.f32 %v743_v18, %v1504_v0 }
 0x16b   :  { %v745_v61 = vadd.f32 %v1477_v51, %v744_v32  ;;  %v878_v26 = vadd.f32 %v877_v20, %v815_v23  ;;  %v820_v51 = vmul.f32 %v1513_v16, %v1513_v16 }
 0x16d   :  { %v879_v27 = vadd.f32 %v878_v26, %v816_v21  ;;  %v746_v29 = vadd.f32 %v1495_v58, %v745_v61  ;;  %v821_v58 = vmul.f32 %v1531_v28, %v1531_v28 }
 0x16f   :  { %v747_v4 = vadd.f32 %v746_v29, %v1522_v19  ;;  %v880_v33 = vadd.f32 %v879_v27, %v817_v30 }
 0x171   :  { %v881_v59 = vadd.f32 %v880_v33, %v818_v53  ;;  %v748_v0 = vadd.f32 %v747_v4, %v1540_v31 }
 0x173   :  { %v749_v36 = vadd.f32 %v1513_v16, %v748_v0  ;;  %v882_v2 = vadd.f32 %v881_v59, %v819_v34 }
 0x175   :  { %v750_v38 = vadd.f32 %v1531_v28, %v749_v36  ;;  %v883_v39 = vadd.f32 %v882_v2, %v820_v51 }
 0x177   :  { %v751_v19 = vrot.slane %v750_v38, 4  ;;  %v884_v17 = vadd.f32 %v883_v39, %v821_v58 }
 0x179   :  { %v752_v40 = vadd.f32 %v751_v19, %v750_v38  ;;  %v885_v41 = vrot.slane %v884_v17, 4 }
 0x17b   :  { %v753_v45 = vrot.slane %v752_v40, 2  ;;  %v886_v24 = vadd.f32 %v885_v41, %v884_v17 }
 0x17d   :  { %v754_v49 = vadd.f32 %v753_v45, %v752_v40  ;;  %v887_v31 = vrot.slane %v886_v24, 2 }
 0x17f   :  { %v755_v15 = vrot.slane %v754_v49, 1  ;;  %v888_v50 = vadd.f32 %v887_v31, %v886_v24 }
 0x181   :  { %v756_v52 = vadd.f32 %v755_v15, %v754_v49  ;;  %v889_v22 = vrot.slane %v888_v50, 1 }
 0x183   :  { %757 = vst [vmem:[%s1653_s3] sm:$0x1] %v756_v52  ;;  %v890_v16 = vadd.f32 %v889_v22, %v888_v50 }
 0x185   :  { %891 = vst [vmem:[%s1653_s3 + $0x1] sm:$0x1] %v890_v16 }

</bundles_post_ra>
